<compile_context>
chip_gen: v6e
topology: v6e:2x2x1
jax: 0.10.0
libtpu: 0.0.40
codegen_flags: <defaults>
</compile_context>

<pallas_src>
import jax
import jax.numpy as jnp
import numpy as np
from jax.experimental import pallas as pl
from jax.experimental.pallas import tpu as pltpu

LANE = 128                  # feature dims padded to this (lane-dense stores)
TM = 128                    # target-node row tile (128 is safe on all gens)
NEG_INF = -1e30
ATT_SLOPE = 0.2             # PyG GATConv attention LeakyReLU slope
ACT_SLOPE = 0.01            # torch.nn.LeakyReLU() default slope
MXU_DTYPE = jnp.bfloat16    # MXU operand / stored-h dtype (f32 accumulate)


def _vmem_limit_bytes():
    cap = 128 * 1024 * 1024
    try:
        cap = int(getattr(pltpu.get_tpu_info(), "vmem_capacity_bytes", cap))
    except Exception:
        pass
    # ~48 MiB on v7x (64 MiB VMEM), 96 MiB on v5e/v6e (128 MiB VMEM)
    return min(cap * 3 // 4, 96 * 1024 * 1024)


VMEM_LIMIT = _vmem_limit_bytes()


def _round_up(x, m):
    return ((x + m - 1) // m) * m


def _pick_tn(np_src):
    """Source-axis tile: bounded VMEM independent of graph size."""
    for tn in (2048, 1024, 512, 256, 128):
        if np_src % tn == 0:
            return tn
    return TM


def _leaky(x, slope):
    return jnp.maximum(x, slope * x)


def _mm(a, b):
    """MXU matmul: bf16 operands, f32 accumulate (kernels AND reference)."""
    return jnp.dot(a.astype(MXU_DTYPE), b.astype(MXU_DTYPE),
                   preferred_element_type=jnp.float32)


# ----------------------------------------------------------------------------
# Kernels
# ----------------------------------------------------------------------------
def project_kernel(x_ref, w_ref, h_ref):
    """Row-tiled linear projection: h[rows] = x[rows] @ W (first layer only)."""
    h_ref[...] = _mm(x_ref[...], w_ref[...]).astype(h_ref.dtype)


def _init_scratch(m_sc, l_sc, acc_sc):
    m_sc[...] = jnp.full_like(m_sc, -jnp.inf)
    l_sc[...] = jnp.zeros_like(l_sc)
    acc_sc[...] = jnp.zeros_like(acc_sc)


def _online_softmax_step(edst, esrc, adj, h_src, m_sc, l_sc, acc_sc):
    """One (TM, TN) block of masked-softmax attention, accumulated online."""
    scores = _leaky(edst + esrc, ATT_SLOPE)               # (TM, TN) f32, VPU
    scores = jnp.where(adj > 0, scores, NEG_INF)          # int8 mask compare
    m_new = jnp.maximum(m_sc[...], scores.max(-1, keepdims=True))
    alpha = jnp.exp(m_sc[...] - m_new)
    p = jnp.exp(scores - m_new)                           # masked -> underflow 0
    l_sc[...] = alpha * l_sc[...] + p.sum(-1, keepdims=True)
    acc_sc[...] = alpha * acc_sc[...] + jnp.dot(
        p.astype(MXU_DTYPE), h_src, preferred_element_type=jnp.float32)
    m_sc[...] = m_new


def gat_hidden_kernel(edst_ref, esrc_ref, adj_ref, h_ref, b_ref, wnext_ref,
                      out_ref, m_sc, l_sc, acc_sc):
    """Hidden GAT layer: online-softmax attention over source tiles, then
    module LeakyReLU fused with the NEXT layer's linear projection."""
    j = pl.program_id(1)

    @pl.when(j == 0)
    def _():
        _init_scratch(m_sc, l_sc, acc_sc)

    _online_softmax_step(edst_ref[...], esrc_ref[...], adj_ref[...], h_ref[...],
                         m_sc, l_sc, acc_sc)

    @pl.when(j == pl.num_programs(1) - 1)
    def _():
        out = acc_sc[...] * pl.reciprocal(l_sc[...], approx=True) + b_ref[...]
        out = _leaky(out, ACT_SLOPE)     # self.act; F.dropout = identity (eval)
        out_ref[...] = _mm(out, wnext_ref[...]).astype(out_ref.dtype)


def gat_final_kernel(edst_ref, esrc_ref, adj_ref, h_ref, b_ref,
                     out_ref, m_sc, l_sc, acc_sc):
    """Final GAT layer: attention only (no activation), f32 node embeddings."""
    j = pl.program_id(1)

    @pl.when(j == 0)
    def _():
        _init_scratch(m_sc, l_sc, acc_sc)

    _online_softmax_step(edst_ref[...], esrc_ref[...], adj_ref[...], h_ref[...],
                         m_sc, l_sc, acc_sc)

    @pl.when(j == pl.num_programs(1) - 1)
    def _():
        out_ref[...] = (acc_sc[...] * pl.reciprocal(l_sc[...], approx=True)
                        + b_ref[...]).astype(out_ref.dtype)


# ----------------------------------------------------------------------------
# pallas_call wrappers (padded shapes)
# ----------------------------------------------------------------------------
def _project(x_p, w_p):
    Np, Di = x_p.shape
    Do = w_p.shape[1]
    return pl.pallas_call(
        project_kernel,
        out_shape=jax.ShapeDtypeStruct((Np, Do), MXU_DTYPE),
        grid=(Np // TM,),
        in_specs=[pl.BlockSpec((TM, Di), lambda t: (t, 0)),
                  pl.BlockSpec((Di, Do), lambda t: (0, 0))],
        out_specs=pl.BlockSpec((TM, Do), lambda t: (t, 0)),
        compiler_params=pltpu.CompilerParams(
            dimension_semantics=("parallel",),
            vmem_limit_bytes=VMEM_LIMIT),
    )(x_p, w_p)


def _gat_layer(h_p, adj_p, e_dst, e_src, bias, w_next=None):
    """One dense GAT layer over a (rows, src-tiles) grid.

    h_p:   (Np, Dh)  bf16 projected features (resident per src tile)
    adj_p: (Np, Np)  int8 adjacency, streamed as (TM, TN) blocks
    e_dst: (Np, 1)   f32 per-target attention logits
    e_src: (1, Np)   f32 per-source attention logits
    """
    Np, Dh = h_p.shape
    tn = _pick_tn(Np)
    grid = (Np // TM, Np // tn)

    in_specs = [
        pl.BlockSpec((TM, 1), lambda i, j: (i, 0)),      # e_dst rows
        pl.BlockSpec((1, tn), lambda i, j: (0, j)),      # e_src cols
        pl.BlockSpec((TM, tn), lambda i, j: (i, j)),     # int8 adj block (streamed)
        pl.BlockSpec((tn, Dh), lambda i, j: (j, 0)),     # bf16 source features
        pl.BlockSpec((1, Dh), lambda i, j: (0, 0)),      # bias
    ]
    args = [e_dst, e_src, adj_p, h_p, bias]

    if w_next is not None:
        Dn = w_next.shape[1]
        in_specs.append(pl.BlockSpec((Dh, Dn), lambda i, j: (0, 0)))
        args.append(w_next)
        kernel, out_dtype, Do = gat_hidden_kernel, MXU_DTYPE, Dn
    else:
        kernel, out_dtype, Do = gat_final_kernel, jnp.float32, Dh

    return pl.pallas_call(
        kernel,
        out_shape=jax.ShapeDtypeStruct((Np, Do), out_dtype),
        grid=grid,
        in_specs=in_specs,
        out_specs=pl.BlockSpec((TM, Do), lambda i, j: (i, 0)),
        scratch_shapes=[pltpu.VMEM((TM, 1), jnp.float32),   # running max
                        pltpu.VMEM((TM, 1), jnp.float32),   # running denom
                        pltpu.VMEM((TM, Dh), jnp.float32)], # accumulator
        compiler_params=pltpu.CompilerParams(
            dimension_semantics=("parallel", "arbitrary"),
            vmem_limit_bytes=VMEM_LIMIT),
    )(*args)


# ----------------------------------------------------------------------------
# Forward pass (GNNEncoder.forward, eval mode)
# ----------------------------------------------------------------------------
def _attention_logits(h_bf16, a_src, a_dst):
    """Hoisted per-node attention scalars (tiny O(N*D) XLA ops, once per layer)."""
    hf = h_bf16.astype(jnp.float32)
    e_src = (hf @ a_src[0])[None, :]       # (1, Np)
    e_dst = (hf @ a_dst[0])[:, None]       # (Np, 1)
    return e_dst, e_src


def gnn_encoder_forward(params, x, adj, pool_mat):
    N, Din = x.shape
    Np = _round_up(N, TM)

    dims = [Din] + [p["w"].shape[1] for p in params]
    dims_p = [_round_up(d, LANE) for d in dims]
    # TODO(synk): for very small true feature dims, un-padded full-dim feature
    # blocks would avoid the lane-padding traffic; kept padded (but bf16) here.

    # zero-pad inputs to lane-/tile-aligned shapes; h path stays bf16
    x_p = jnp.zeros((Np, dims_p[0]), MXU_DTYPE).at[:N, :Din].set(
        x.astype(MXU_DTYPE))

    adj_p = jnp.zeros((Np, Np), jnp.int8).at[:N, :N].set(
        (adj > 0).astype(jnp.int8))
    # padded target rows get a self-loop so their softmax stays well-defined
    pad_diag = jnp.diag(jnp.arange(Np) >= N)
    adj_p = jnp.where(pad_diag, 1, adj_p).astype(jnp.int8)

    padded = []
    for l, p in enumerate(params):
        din, dout = p["w"].shape
        dpi, dpo = dims_p[l], dims_p[l + 1]
        padded.append(dict(
            w=jnp.zeros((dpi, dpo), MXU_DTYPE).at[:din, :dout].set(
                p["w"].astype(MXU_DTYPE)),
            a_src=jnp.zeros((1, dpo), jnp.float32).at[:, :dout].set(p["a_src"]),
            a_dst=jnp.zeros((1, dpo), jnp.float32).at[:, :dout].set(p["a_dst"]),
            b=jnp.zeros((1, dpo), jnp.float32).at[:, :dout].set(p["b"]),
        ))

    # layer-0 projection (x @ W0) -> bf16 resident h
    h = _project(x_p, padded[0]["w"])

    # hidden layers: attention + LeakyReLU fused with the NEXT layer's projection
    for l in range(len(params) - 1):
        pc = padded[l]
        e_dst, e_src = _attention_logits(h, pc["a_src"], pc["a_dst"])
        h = _gat_layer(h, adj_p, e_dst, e_src, pc["b"], padded[l + 1]["w"])

    # final layer: attention only, f32 node embeddings
    pL = padded[-1]
    e_dst, e_src = _attention_logits(h, pL["a_src"], pL["a_dst"])
    node_p = _gat_layer(h, adj_p, e_dst, e_src, pL["b"], None)

    Dout = params[-1]["w"].shape[1]
    node_emb = node_p[:N, :Dout]
    # global_add_pool UN-fused (plain XLA) so the final kernel stays "parallel".
    graph_emb = pool_mat @ node_emb
    return node_emb, graph_emb


def init_gat_params(key, din, dout):
    k1, k2, k3 = jax.random.split(key, 3)
    glorot = lambda k, shape: (jax.random.normal(k, shape, jnp.float32)
                               * jnp.sqrt(2.0 / (shape[0] + shape[1])))
    return dict(w=glorot(k1, (din, dout)),
                a_src=glorot(k2, (1, dout)),
                a_dst=glorot(k3, (1, dout)),
                b=jnp.zeros((1, dout), jnp.float32))


# ----------------------------------------------------------------------------
# Pure-JAX reference (same dense-GAT math, same bf16 storage / MXU operands)
# ----------------------------------------------------------------------------
def _forward_ref(params, x, adj, pool_mat):
    mask = adj > 0
    h = x.astype(MXU_DTYPE)
    node = None
    for l, p in enumerate(params):
        z = _mm(h, p["w"])                          # f32
        zb = z.astype(MXU_DTYPE)                    # stored precision
        zf = zb.astype(jnp.float32)
        e_src = (zf @ p["a_src"][0])[None, :]       # (1, N)
        e_dst = (zf @ p["a_dst"][0])[:, None]       # (N, 1)
        scores = _leaky(e_dst + e_src, ATT_SLOPE)
        scores = jnp.where(mask, scores, NEG_INF)
        m = scores.max(-1, keepdims=True)
        pw = jnp.exp(scores - m)
        out = _mm(pw, zb) / pw.sum(-1, keepdims=True) + p["b"]
        if l < len(params) - 1:
            h = _leaky(out, ACT_SLOPE).astype(MXU_DTYPE)
        else:
            node = out
    return node, pool_mat @ node


# ----------------------------------------------------------------------------
if __name__ == "__main__":
    key = jax.random.PRNGKey(0)

    # Small synthetic graph batch: 2 graphs x 8 nodes = 16 nodes.
    num_graphs, nodes_per_graph = 2, 8
    N = num_graphs * nodes_per_graph
    input_dim, hidden_dim, output_dim = 16, 32, 32

    k_x, k_e, k_p0, k_p1 = jax.random.split(key, 4)
    x = jax.random.normal(k_x, (N, input_dim), jnp.float32)

    # edge_index: directed ring within each graph + a few random intra-graph edges
    src, dst = [], []
    for g in range(num_graphs):
        base = g * nodes_per_graph
        for i in range(nodes_per_graph):
            src.append(base + i)
            dst.append(base + (i + 1) % nodes_per_graph)
    rnd = jax.random.randint(k_e, (2, 8), 0, nodes_per_graph)
    for c in range(rnd.shape[1]):
        g = c % num_graphs
        src.append(g * nodes_per_graph + int(rnd[0, c]))
        dst.append(g * nodes_per_graph + int(rnd[1, c]))
    edge_index = np.array([src, dst], dtype=np.int32)

    # dense adjacency (target, source) with self-loops
    adj_np = np.zeros((N, N), dtype=np.float32)
    adj_np[edge_index[1], edge_index[0]] = 1.0
    np.fill_diagonal(adj_np, 1.0)
    adj = jnp.asarray(adj_np)

    # batch vector -> one-hot pool matrix (num_graphs, N)
    batch = np.repeat(np.arange(num_graphs), nodes_per_graph)
    pool_mat = jnp.asarray(
        (batch[None, :] == np.arange(num_graphs)[:, None]).astype(np.float32))

    # n_layer=2: conv(input->hidden), conv(hidden->output)
    params = [init_gat_params(k_p0, input_dim, hidden_dim),
              init_gat_params(k_p1, hidden_dim, output_dim)]

    node_emb, graph_emb = gnn_encoder_forward(params, x, adj, pool_mat)
    node_emb = jax.block_until_ready(node_emb)
    graph_emb = jax.block_until_ready(graph_emb)

    node_ref, graph_ref = _forward_ref(params, x, adj, pool_mat)
    np.testing.assert_allclose(np.asarray(node_emb), np.asarray(node_ref),
                               rtol=2e-2, atol=2e-2)
    np.testing.assert_allclose(np.asarray(graph_emb), np.asarray(graph_ref),
                               rtol=2e-2, atol=2e-2)

    assert node_emb.shape == (N, output_dim)
    assert graph_emb.shape == (num_graphs, output_dim)
    print("KERNEL_OK")
</pallas_src>

<mosaic_0001>
module attributes {stable_mosaic.version = 11 : i64} {
  func.func @project_kernel(%arg0: i32, %arg1: memref<128x128xbf16, #tpu.memory_space<vmem>>, %arg2: memref<128x128xbf16, #tpu.memory_space<vmem>>, %arg3: memref<128x128xbf16, #tpu.memory_space<vmem>>) attributes {dimension_semantics = [#tpu.dimension_semantics<parallel>], iteration_bounds = array<i64: 1>, scalar_prefetch = 0 : i64, scratch_operands = 0 : i64, tpu.core_type = #tpu.core_type<tc>, window_params = [{transform_indices = @transform_0, window_bounds = array<i64: 128, 128>}, {pipeline_mode = #tpu.pipeline_mode<synchronous>, transform_indices = @transform_1, window_bounds = array<i64: 128, 128>}, {transform_indices = @transform_2, window_bounds = array<i64: 128, 128>}]} {
    %c0 = arith.constant 0 : index
    %c0_0 = arith.constant 0 : index
    %0 = vector.load %arg1[%c0, %c0_0] : memref<128x128xbf16, #tpu.memory_space<vmem>>, vector<128x128xbf16>
    %c0_1 = arith.constant 0 : index
    %c0_2 = arith.constant 0 : index
    %1 = vector.load %arg2[%c0_1, %c0_2] : memref<128x128xbf16, #tpu.memory_space<vmem>>, vector<128x128xbf16>
    %cst = arith.constant dense<0.000000e+00> : vector<128x128xf32>
    %2 = tpu.matmul %0, %1, %cst {dimension_numbers = #tpu.dot_dimension_numbers<[1], [0], [0], [1], [0, 0, 1, 1], [], []>} : vector<128x128xbf16>, vector<128x128xbf16>, vector<128x128xf32> -> vector<128x128xf32>
    %3 = arith.truncf %2 : vector<128x128xf32> to vector<128x128xbf16>
    %c0_3 = arith.constant 0 : index
    %c0_4 = arith.constant 0 : index
    %4 = vector.load %arg3[%c0_3, %c0_4] : memref<128x128xbf16, #tpu.memory_space<vmem>>, vector<128x128xbf16>
    tpu.vector_store %arg3[%c0_3, %c0_4], %3 {strides = array<i32>} : memref<128x128xbf16, #tpu.memory_space<vmem>>, vector<128x128xbf16>,
    return
  }
  func.func @transform_0(%arg0: i32) -> (i32, i32) {
    %c0_i32 = arith.constant 0 : i32
    %c0_i32_0 = arith.constant 0 : i32
    return %arg0, %c0_i32 : i32, i32
  }
  func.func @transform_1(%arg0: i32) -> (i32, i32) {
    %c0_i32 = arith.constant 0 : i32
    %c0_i32_0 = arith.constant 0 : i32
    %c0_i32_1 = arith.constant 0 : i32
    return %c0_i32, %c0_i32_0 : i32, i32
  }
  func.func @transform_2(%arg0: i32) -> (i32, i32) {
    %c0_i32 = arith.constant 0 : i32
    %c0_i32_0 = arith.constant 0 : i32
    return %arg0, %c0_i32 : i32, i32
  }
}

</mosaic_0001>

<bundles_post_ra>
// kernel: tpu_custom_call.1
= control target key start
LH: loop header
LB: loop body
LE: loop exit
PB: predicated region body
PF: predicated region fallthrough
CT: control target
= control target key end

     0   :  { %7 = vsyncpa [#allocation3], 0  ;;  %s648_s0 = inlined_call_operand.hbm [shape: bf16[128,128], index: 0, kind: input, shape index: {}]   ;;  %s649_s1 = inlined_call_operand.hbm [shape: bf16[128,128], index: 1, kind: input, shape index: {}]   ;;  %s650_s2 = inlined_call_operand.hbm [shape: bf16[128,128], index: 2, kind: output, shape index: {}]  }
   0x1   :  { %8 = vsyncpa [#allocation6], 0 }
   0x2   :  { %9 = vsyncpa [#allocation4], 0  ;;  %s610_s9 = smov [#allocation2]  }
   0x3   :  { %s15_s10 = sshll.u32 %s610_s9, 4  ;;  %s16_s10 = int_to_ptr.vmem [resolvable:$true] %s15_s10 }
   0x4   :  { %s552_s11 = scalar_lea.vmem %s16_s10, 1024  ;;  %p557_p1 = scmp.lt.s32.totalorder %s16_s10, %s16_s10 }
   0x5   :  { %p553_p0 = scmp.ne.s32.totalorder %s16_s10, %s552_s11  ;;  %p558_p2 = scmp.lt.s32.totalorder %s552_s11, %s552_s11 }
   0x7   :  { %p559_p3 = por %p558_p2, %p557_p1 }
   0x9   :  { %p560_p4 = pnand %p559_p3, %p553_p0 }
   0xb   :  { %563 = shalt.err (!%p560_p4)
}
   0xc   :  { %s611_s12 = smov 64   ;;  %s612_s13 = smov 4  }
   0xd   :  { %21 = dma.hbm_to_vmem [thread:$0]  %s648_s0, 1024, %s16_s10, [#allocation3], %s611_s12, %s611_s12, %s612_s13  }
   0xe   :  { %s613_s16 = smov [#allocation5]  }
   0xf   :  { %s27_s17 = sshll.u32 %s613_s16, 4  ;;  %s28_s17 = int_to_ptr.vmem [resolvable:$true] %s27_s17 }
  0x10   :  { %s572_s18 = scalar_lea.vmem %s28_s17, 1024  ;;  %p577_p6 = scmp.lt.s32.totalorder %s28_s17, %s28_s17 }
  0x11   :  { %p573_p5 = scmp.ne.s32.totalorder %s28_s17, %s572_s18  ;;  %p578_p7 = scmp.lt.s32.totalorder %s572_s18, %s572_s18 }
  0x13   :  { %p579_p8 = por %p578_p7, %p577_p6 }
  0x15   :  { %p580_p9 = pnand %p579_p8, %p573_p5 }
  0x17   :  { %583 = shalt.err (!%p580_p9)
}
  0x18   :  { %33 = dma.hbm_to_vmem [thread:$0]  %s649_s1, 1024, %s28_s17, [#allocation6], %s611_s12, %s611_s12, %s612_s13  }
  0x19   :  { %604 = dma.done.wait [#allocation3], 1024  }
  0x1a   :  { %605 = vsyncadd [#allocation3], 4294966272 }
  0x1b   :  { %606 = dma.done.wait [#allocation6], 1024  }
  0x1c   :  { %607 = vsyncadd [#allocation6], 4294966272  ;;  %v528_v0 = vld [vmem:[#allocation5 + $0x38] sm:$0xff]   ;;  %v529_v1 = vld [vmem:[#allocation5 + $0x30] sm:$0xff]   ;;  %s614_s0 = smov [#allocation7]  }
  0x1d   :  { %475 = vmatprep.subr.bf16.mxu0 %v528_v0  ;;  %507 = vmatprep.subr.bf16.mxu1 %v528_v0  ;;  %v530_v2 = vld [vmem:[#allocation5 + $0x28] sm:$0xff]   ;;  %v531_v3 = vld [vmem:[#allocation5 + $0x20] sm:$0xff]   ;;  %v532_v6 = vld [vmem:[#allocation5 + $0x18] sm:$0xff]   ;;  %s351_s1 = sshll.u32 %s614_s0, 4  ;;  %s352_s1 = int_to_ptr.vmem [resolvable:$true] %s351_s1 }
  0x1e   :  { %476 = vmatpush3.bf16.msra.mxu0 %v528_v0  ;;  %515 = vmatpush3.bf16.msra.mxu1 %v528_v0  ;;  %v536_v4 = vld [vmem:[#allocation2] sm:$0xff]   ;;  %v533_v7 = vld [vmem:[#allocation5 + $0x10] sm:$0xff]   ;;  %v534_v8 = vld [vmem:[#allocation5 + $0x8] sm:$0xff]   ;;  %s584_s21 = scalar_lea.vmem %s352_s1, 1024  ;;  %p589_p11 = scmp.lt.s32.totalorder %s352_s1, %s352_s1 }
  0x1f   :  { %477 = vmatprep.subr.bf16.mxu0 %v529_v1  ;;  %508 = vmatprep.subr.bf16.mxu1 %v529_v1  ;;  %v537_v5 = vld [vmem:[#allocation2 + $0x20] sm:$0xff]   ;;  %v538_v10 = vld [vmem:[#allocation2 + $0x8] sm:$0xff]   ;;  %v540_v12 = vld [vmem:[#allocation2 + $0x10] sm:$0xff]   ;;  %p585_p10 = scmp.ne.s32.totalorder %s352_s1, %s584_s21  ;;  %p590_p12 = scmp.lt.s32.totalorder %s584_s21, %s584_s21 }
  0x20   :  { %491 = vmatprep.mubr.bf16.mxu0 %v536_v4  ;;  %499 = vmatprep.mubr.bf16.mxu1 %v537_v5  ;;  %v535_v9 = vld [vmem:[#allocation5] sm:$0xff]   ;;  %v539_v11 = vld [vmem:[#allocation2 + $0x28] sm:$0xff]   ;;  %v541_v13 = vld [vmem:[#allocation2 + $0x30] sm:$0xff]  }
  0x21   :  { %v542_v14 = vld [vmem:[#allocation2 + $0x18] sm:$0xff]   ;;  %p591_p13 = por %p590_p12, %p589_p11 }
  0x22   :  { %478 = vmatpush3.bf16.msra.mxu0 %v529_v1  ;;  %516 = vmatpush3.bf16.msra.mxu1 %v529_v1  ;;  %v543_v15 = vld [vmem:[#allocation2 + $0x38] sm:$0xff]  }
  0x23   :  { %479 = vmatprep.subr.bf16.mxu0 %v530_v2  ;;  %509 = vmatprep.subr.bf16.mxu1 %v530_v2  ;;  %p592_p0 = pnand %p591_p13, %p585_p10 }
  0x26   :  { %480 = vmatpush3.bf16.msra.mxu0 %v530_v2  ;;  %517 = vmatpush3.bf16.msra.mxu1 %v530_v2 }
  0x27   :  { %481 = vmatprep.subr.bf16.mxu0 %v531_v3  ;;  %510 = vmatprep.subr.bf16.mxu1 %v531_v3 }
  0x2a   :  { %482 = vmatpush3.bf16.msra.mxu0 %v531_v3  ;;  %518 = vmatpush3.bf16.msra.mxu1 %v531_v3 }
  0x2b   :  { %483 = vmatprep.subr.bf16.mxu0 %v532_v6  ;;  %511 = vmatprep.subr.bf16.mxu1 %v532_v6 }
  0x2e   :  { %484 = vmatpush3.bf16.msra.mxu0 %v532_v6  ;;  %519 = vmatpush3.bf16.msra.mxu1 %v532_v6 }
  0x2f   :  { %485 = vmatprep.subr.bf16.mxu0 %v533_v7  ;;  %512 = vmatprep.subr.bf16.mxu1 %v533_v7 }
  0x32   :  { %486 = vmatpush3.bf16.msra.mxu0 %v533_v7  ;;  %520 = vmatpush3.bf16.msra.mxu1 %v533_v7 }
  0x33   :  { %487 = vmatprep.subr.bf16.mxu0 %v534_v8  ;;  %513 = vmatprep.subr.bf16.mxu1 %v534_v8 }
  0x36   :  { %488 = vmatpush3.bf16.msra.mxu0 %v534_v8  ;;  %521 = vmatpush3.bf16.msra.mxu1 %v534_v8 }
  0x37   :  { %489 = vmatprep.subr.bf16.mxu0 %v535_v9  ;;  %514 = vmatprep.subr.bf16.mxu1 %v535_v9 }
  0x3a   :  { %490 = vmatpush3.bf16.msra.mxu0 %v535_v9  ;;  %522 = vmatpush3.bf16.msra.mxu1 %v535_v9 }
  0x3d   :  { %492 = vmatmul.mubr.bf16.vlgmr.msra.gmra.mxu0 %v538_v10  ;;  %500 = vmatmul.mubr.bf16.vlgmr.msra.gmra.mxu1 %v539_v11 }
  0x3e   :  { %495 = vmatprep.mubr.bf16.mxu0 %v540_v12  ;;  %503 = vmatprep.mubr.bf16.mxu1 %v541_v13 }
  0x45   :  { %496 = vmatmul.mubr.bf16.gmra.mxu0 %v542_v14  ;;  %504 = vmatmul.mubr.bf16.gmra.mxu1 %v543_v15 }
  0xfd   :  { %v493_v16 = vpop.f32.mrf.mxu0  ;;  %v501_v17 = vpop.f32.mrf.mxu1 }
  0xff   :  { %v203_v18 = vpop.f32.mrf.mxu0  ;;  %v235_v19 = vpop.f32.mrf.mxu1 }
 0x101   :  { %v494_v20 = vpop.f32.mrf.mxu0  ;;  %v502_v21 = vpop.f32.mrf.mxu1 }
 0x102   :  { %v420_v22 = vpack.c.bf16 %v494_v20, %v493_v16  ;;  %v440_v23 = vpack.c.bf16 %v502_v21, %v501_v17 }
 0x103   :  { %v206_v24 = vpop.f32.mrf.mxu0  ;;  %v238_v25 = vpop.f32.mrf.mxu1 }
 0x104   :  { %452 = vst [vmem:[#allocation7 + $0x8] sm:$0xff] %v420_v22   ;;  %456 = vst [vmem:[#allocation7 + $0x28] sm:$0xff] %v440_v23   ;;  %v415_v26 = vpack.c.bf16 %v206_v24, %v203_v18  ;;  %v435_v27 = vpack.c.bf16 %v238_v25, %v235_v19 }
 0x105   :  { %v497_v28 = vpop.f32.mrf.mxu0  ;;  %v505_v29 = vpop.f32.mrf.mxu1 }
 0x106   :  { %416 = vst [vmem:[#allocation7] sm:$0xff] %v415_v26   ;;  %455 = vst [vmem:[#allocation7 + $0x20] sm:$0xff] %v435_v27  }
 0x107   :  { %v219_v30 = vpop.f32.mrf.mxu0  ;;  %v251_v31 = vpop.f32.mrf.mxu1 }
 0x109   :  { %v498_v32 = vpop.f32.mrf.mxu0  ;;  %v506_v33 = vpop.f32.mrf.mxu1 }
 0x10a   :  { %v430_v34 = vpack.c.bf16 %v498_v32, %v497_v28  ;;  %v450_v35 = vpack.c.bf16 %v506_v33, %v505_v29 }
 0x10b   :  { %v222_v36 = vpop.f32.mrf.mxu0  ;;  %v254_v37 = vpop.f32.mrf.mxu1 }
 0x10c   :  { %454 = vst [vmem:[#allocation7 + $0x18] sm:$0xff] %v430_v34   ;;  %458 = vst [vmem:[#allocation7 + $0x38] sm:$0xff] %v450_v35   ;;  %v425_v38 = vpack.c.bf16 %v222_v36, %v219_v30  ;;  %v445_v39 = vpack.c.bf16 %v254_v37, %v251_v31 }
 0x10e   :  { %453 = vst [vmem:[#allocation7 + $0x10] sm:$0xff] %v425_v38   ;;  %457 = vst [vmem:[#allocation7 + $0x30] sm:$0xff] %v445_v39  }
 0x10f   :  { %595 = shalt.err (!%p592_p0)
}
 0x110   :  { %357 = dma.vmem_to_hbm [thread:$0]  %s352_s1, 1024, %s650_s2, [#allocation4], %s611_s12, %s611_s12, %s612_s13  }
 0x111   :  { %608 = dma.done.wait [#allocation4], 1024  }
 0x112   :  { %609 = vsyncadd [#allocation4], 4294966272 }
 0x113   :  { %361 = vsyncpa [#allocation3], 1 }
 0x114   :  { %362 = vsyncpa [#allocation6], 1 }
 0x115   :  { %363 = vsyncpa [#allocation4], 1 }

</bundles_post_ra>
